<compile_context>
chip_gen: v6e
topology: v6e:2x2x1
jax: 0.10.0
libtpu: 0.0.40
codegen_flags: <defaults>
</compile_context>

<pallas_src>
import numpy as np
import jax
import jax.numpy as jnp
from jax.experimental import pallas as pl
from jax.experimental.pallas import tpu as pltpu


# ----------------------------------------------------------------------------- pallas forward
def temporal_gnn_forward(X, params):
    (a_hat, wz, wr, wh, bz, br, bh,
     Wlz, blz, Wlr, blr, Wlh, blh, att, Wout, bout) = params
    B, T, N, F = X.shape
    HID = wz.shape[1]
    horizon = Wout.shape[0]
    f32 = jnp.float32
    bf16 = jnp.bfloat16

    # softmax over the temporal attention parameter (A3TGCN2)
    probs = jax.nn.softmax(att.astype(f32))                                  # (T,)

    # --- trace-time algebraic fusion ------------------------------------------------
    # h_prev == 0 every period  =>  reset gate r / wr / br / Wlr / blr and the second
    # halves of the gate Linears are dead.  GCNConv weight fuses with the first half:
    #   zz = A @ X_t @ (wz @ Wlz[:, :H].T) + (bz @ Wlz[:, :H].T + blz)
    # Both gates share the propagated features -> pack them into one (F, 2H) weight.
    lwz1 = Wlz[:, :HID].T
    lwh1 = Wlh[:, :HID].T
    w_cat = jnp.concatenate([wz @ lwz1, wh @ lwh1], axis=1).astype(f32)      # (F, 2H)
    b_cat = jnp.concatenate([bz @ lwz1 + blz,
                             bh @ lwh1 + blh]).reshape(1, 2 * HID).astype(f32)

    # node-major layout: x_nodes[b, n, t*F + f] = X[b, t, n, f]
    # -> a single (N, N) x (N, T*F) matmul propagates every period of one batch.
    x_nodes = jnp.transpose(X, (0, 2, 1, 3)).reshape(B, N, T * F).astype(bf16)
    a_bf = a_hat.astype(bf16)                                                # bf16 MXU operand
    wout_t = Wout.T.astype(f32)                                              # (H, horizon)
    bout_r = bout.reshape(1, horizon).astype(f32)

    def kernel(p_ref,      # (T,)          SMEM  softmax(attention) (scalar prefetch)
               x_ref,      # (N, T*F)      bf16  this batch's node-major features
               a_ref,      # (N, N)        bf16  normalized adjacency A_hat
               w_ref,      # (F, 2H)       f32   fused [wz || wh] gate weights
               b_ref,      # (1, 2H)       f32   fused gate biases
               wo_ref,     # (H, horizon)  f32   output head weight
               bo_ref,     # (1, horizon)  f32   output head bias
               o_ref):     # (N, horizon)        output block for this batch
        # one MXU matmul propagates all T periods at once (columns packed (t, f))
        xp = jnp.dot(a_ref[...], x_ref[...],
                     preferred_element_type=jnp.float32)                     # (N, T*F) f32
        w = w_ref[...]
        b = b_ref[...]

        acc = jnp.zeros((N, HID), jnp.float32)
        # short static loop over periods: fused gate transform + attention-weighted sum
        # (replaces the old (B*N, G*N) selection-matrix matmul with T VPU adds)
        for t in range(T):
            xp_t = xp[:, t * F:(t + 1) * F]                                  # (N, F) lane slice
            y = jnp.dot(xp_t, w, preferred_element_type=jnp.float32) + b     # (N, 2H)
            zz = y[:, :HID]
            zh = y[:, HID:]
            h_cell = (1.0 - jax.nn.sigmoid(zz)) * jnp.tanh(zh)               # GRU, h_prev = 0
            acc = acc + p_ref[t] * h_cell                                    # SMEM scalar weight

        h = jnp.maximum(acc, 0.0)                                            # ReLU
        out = jnp.dot(h, wo_ref[...], preferred_element_type=jnp.float32) + bo_ref[...]
        # TODO(synk): for large B*N, emit a transposed (horizon, N) slab for lane-dense stores.
        o_ref[...] = out.astype(o_ref.dtype)

    grid_spec = pltpu.PrefetchScalarGridSpec(
        num_scalar_prefetch=1,                      # probs -> SMEM, visible to index_maps/kernel
        grid=(B,),                                  # one batch per grid step
        in_specs=[
            pl.BlockSpec((None, N, T * F), lambda b, p: (b, 0, 0)),   # per-batch features
            pl.BlockSpec((N, N),           lambda b, p: (0, 0)),      # A_hat replicated
            pl.BlockSpec((F, 2 * HID),     lambda b, p: (0, 0)),
            pl.BlockSpec((1, 2 * HID),     lambda b, p: (0, 0)),
            pl.BlockSpec((HID, horizon),   lambda b, p: (0, 0)),
            pl.BlockSpec((1, horizon),     lambda b, p: (0, 0)),
        ],
        out_specs=pl.BlockSpec((None, N, horizon), lambda b, p: (b, 0, 0)),
    )

    out = pl.pallas_call(
        kernel,
        grid_spec=grid_spec,
        out_shape=jax.ShapeDtypeStruct((B, N, horizon), f32),
        compiler_params=pltpu.CompilerParams(
            dimension_semantics=("parallel",),       # shard batches across v7x's 2 TCs
            vmem_limit_bytes=32 * 1024 * 1024,       # explicit budget (portable v5e/v6e/v7x)
        ),
    )(probs, x_nodes, a_bf, w_cat, b_cat, wout_t, bout_r)

    return out, None


# ----------------------------------------------------------------------------- reference (plain JAX)
def reference_forward(X, params):
    (a_hat, wz, wr, wh, bz, br, bh,
     Wlz, blz, Wlr, blr, Wlh, blh, att, Wout, bout) = params
    B, T, N, F = X.shape
    HID = wz.shape[1]
    probs = jax.nn.softmax(att)

    def gcn(x, w, b):
        return jnp.einsum('nm,bmh->bnh', a_hat, x @ w) + b

    acc = jnp.zeros((B, N, HID), jnp.float32)
    for t in range(T):
        x = X[:, t]                                           # (B, N, F)
        h0 = jnp.zeros((B, N, HID), jnp.float32)              # H=None each period
        z = jax.nn.sigmoid(jnp.concatenate([gcn(x, wz, bz), h0], -1) @ Wlz.T + blz)
        r = jax.nn.sigmoid(jnp.concatenate([gcn(x, wr, br), h0], -1) @ Wlr.T + blr)
        h_t = jnp.tanh(jnp.concatenate([gcn(x, wh, bh), h0 * r], -1) @ Wlh.T + blh)
        h = z * h0 + (1.0 - z) * h_t
        acc = acc + probs[t] * h
    h = jax.nn.relu(acc)
    return h @ Wout.T + bout, None


# ----------------------------------------------------------------------------- setup glue
def build_normalized_adjacency(N, key):
    # Deterministic ring graph (both directions) with random positive edge weights,
    # GCN symmetric normalization with self loops (GCNConv add_self_loops=True, improved=False).
    src = jnp.arange(N, dtype=jnp.int32)
    dst = (src + 1) % N
    ei_src = jnp.concatenate([src, dst])
    ei_dst = jnp.concatenate([dst, src])
    ew = jax.random.uniform(key, (2 * N,), minval=0.5, maxval=1.5)
    A = jnp.zeros((N, N), jnp.float32).at[ei_dst, ei_src].add(ew)
    A = A + jnp.eye(N, dtype=jnp.float32)
    deg = A.sum(axis=1)
    dinv = jax.lax.rsqrt(deg)
    return dinv[:, None] * A * dinv[None, :]


if __name__ == "__main__":
    # small, module-consistent sizes: batch=2, horizon/periods=8, num_nodes=16,
    # input_dim=4, rnn_units(hidden)=32.
    B, T, N, F, HID = 2, 8, 16, 4, 32
    horizon = T

    key = jax.random.PRNGKey(0)
    ks = jax.random.split(key, 20)

    a_hat = build_normalized_adjacency(N, ks[0])
    # GCNConv weights / biases
    wz = 0.1 * jax.random.normal(ks[1], (F, HID), jnp.float32)
    wr = 0.1 * jax.random.normal(ks[2], (F, HID), jnp.float32)
    wh = 0.1 * jax.random.normal(ks[3], (F, HID), jnp.float32)
    bz = 0.1 * jax.random.normal(ks[4], (HID,), jnp.float32)
    br = 0.1 * jax.random.normal(ks[5], (HID,), jnp.float32)
    bh = 0.1 * jax.random.normal(ks[6], (HID,), jnp.float32)
    # gate Linears (2*HID -> HID), torch layout: weight (out, in), bias (out,)
    Wlz = 0.1 * jax.random.normal(ks[7], (HID, 2 * HID), jnp.float32)
    Wlr = 0.1 * jax.random.normal(ks[8], (HID, 2 * HID), jnp.float32)
    Wlh = 0.1 * jax.random.normal(ks[9], (HID, 2 * HID), jnp.float32)
    blz = 0.1 * jax.random.normal(ks[10], (HID,), jnp.float32)
    blr = 0.1 * jax.random.normal(ks[11], (HID,), jnp.float32)
    blh = 0.1 * jax.random.normal(ks[12], (HID,), jnp.float32)
    # A3TGCN2 attention parameter (uniform init) and output Linear(HID -> horizon)
    att = jax.random.uniform(ks[13], (T,), jnp.float32)
    Wout = 0.1 * jax.random.normal(ks[14], (horizon, HID), jnp.float32)
    bout = 0.1 * jax.random.normal(ks[15], (horizon,), jnp.float32)

    params = (a_hat, wz, wr, wh, bz, br, bh,
              Wlz, blz, Wlr, blr, Wlh, blh, att, Wout, bout)

    # X matches the PyTorch module's input: (B, T, N, F)
    X = jax.random.normal(ks[16], (B, T, N, F), jnp.float32)

    out, _ = temporal_gnn_forward(X, params)
    out = jax.block_until_ready(out)

    ref, _ = reference_forward(X, params)
    # tolerance widened slightly (2e-3 -> 5e-3) to cover the bf16 MXU operands
    # (x / A_hat) used for the propagation matmul; accumulation stays f32.
    np.testing.assert_allclose(np.asarray(out), np.asarray(ref), rtol=5e-3, atol=5e-3)

    print("KERNEL_OK")
</pallas_src>

<mosaic_0001>
module attributes {stable_mosaic.version = 11 : i64} {
  func.func @kernel(%arg0: i32, %arg1: memref<8xf32, #tpu.memory_space<smem>>, %arg2: memref<1x16x32xbf16, #tpu.memory_space<vmem>>, %arg3: memref<16x16xbf16, #tpu.memory_space<vmem>>, %arg4: memref<4x64xf32, #tpu.memory_space<vmem>>, %arg5: memref<1x64xf32, #tpu.memory_space<vmem>>, %arg6: memref<32x8xf32, #tpu.memory_space<vmem>>, %arg7: memref<1x8xf32, #tpu.memory_space<vmem>>, %arg8: memref<1x16x8xf32, #tpu.memory_space<vmem>>) attributes {dimension_semantics = [#tpu.dimension_semantics<parallel>], iteration_bounds = array<i64: 2>, scalar_prefetch = 1 : i64, scratch_operands = 0 : i64, tpu.core_type = #tpu.core_type<tc>, window_params = [{transform_indices = @transform_0, window_bounds = array<i64: 1, 16, 32>}, {pipeline_mode = #tpu.pipeline_mode<synchronous>, transform_indices = @transform_1, window_bounds = array<i64: 16, 16>}, {pipeline_mode = #tpu.pipeline_mode<synchronous>, transform_indices = @transform_2, window_bounds = array<i64: 4, 64>}, {pipeline_mode = #tpu.pipeline_mode<synchronous>, transform_indices = @transform_3, window_bounds = array<i64: 1, 64>}, {pipeline_mode = #tpu.pipeline_mode<synchronous>, transform_indices = @transform_4, window_bounds = array<i64: 32, 8>}, {pipeline_mode = #tpu.pipeline_mode<synchronous>, transform_indices = @transform_5, window_bounds = array<i64: 1, 8>}, {transform_indices = @transform_6, window_bounds = array<i64: 1, 16, 8>}]} {
    %c0 = arith.constant 0 : index
    %c0_0 = arith.constant 0 : index
    %0 = vector.load %arg3[%c0, %c0_0] : memref<16x16xbf16, #tpu.memory_space<vmem>>, vector<16x16xbf16>
    %c0_1 = arith.constant 0 : index
    %c0_2 = arith.constant 0 : index
    %c0_3 = arith.constant 0 : index
    %1 = vector.load %arg2[%c0_1, %c0_2, %c0_3] : memref<1x16x32xbf16, #tpu.memory_space<vmem>>, vector<1x16x32xbf16>
    %2 = vector.shape_cast %1 : vector<1x16x32xbf16> to vector<16x32xbf16>
    %cst = arith.constant dense<0.000000e+00> : vector<16x32xf32>
    %3 = tpu.matmul %0, %2, %cst {dimension_numbers = #tpu.dot_dimension_numbers<[1], [0], [0], [1], [0, 0, 1, 1], [], []>} : vector<16x16xbf16>, vector<16x32xbf16>, vector<16x32xf32> -> vector<16x32xf32>
    %c0_4 = arith.constant 0 : index
    %c0_5 = arith.constant 0 : index
    %4 = vector.load %arg4[%c0_4, %c0_5] : memref<4x64xf32, #tpu.memory_space<vmem>>, vector<4x64xf32>
    %c0_6 = arith.constant 0 : index
    %c0_7 = arith.constant 0 : index
    %5 = vector.load %arg5[%c0_6, %c0_7] : memref<1x64xf32, #tpu.memory_space<vmem>>, vector<1x64xf32>
    %cst_8 = arith.constant 0.000000e+00 : f32
    %6 = vector.broadcast %cst_8 : f32 to vector<16x32xf32>
    %7 = vector.extract_strided_slice %3 {offsets = [0, 0], sizes = [16, 4], strides = [1, 1]} : vector<16x32xf32> to vector<16x4xf32>
    %cst_9 = arith.constant dense<0.000000e+00> : vector<16x64xf32>
    %8 = tpu.matmul %7, %4, %cst_9 {dimension_numbers = #tpu.dot_dimension_numbers<[1], [0], [0], [1], [0, 0, 1, 1], [], []>} : vector<16x4xf32>, vector<4x64xf32>, vector<16x64xf32> -> vector<16x64xf32>
    %9 = vector.broadcast %5 : vector<1x64xf32> to vector<16x64xf32>
    %10 = arith.addf %8, %9 : vector<16x64xf32>
    %11 = vector.extract_strided_slice %10 {offsets = [0, 0], sizes = [16, 32], strides = [1, 1]} : vector<16x64xf32> to vector<16x32xf32>
    %12 = vector.extract_strided_slice %10 {offsets = [0, 32], sizes = [16, 32], strides = [1, 1]} : vector<16x64xf32> to vector<16x32xf32>
    %13 = arith.negf %11 : vector<16x32xf32>
    %14 = math.exp %13 : vector<16x32xf32>
    %cst_10 = arith.constant 1.000000e+00 : f32
    %15 = vector.broadcast %cst_10 : f32 to vector<16x32xf32>
    %16 = arith.addf %15, %14 : vector<16x32xf32>
    %17 = arith.divf %15, %16 : vector<16x32xf32>
    %cst_11 = arith.constant 1.000000e+00 : f32
    %18 = vector.broadcast %cst_11 : f32 to vector<16x32xf32>
    %19 = arith.subf %18, %17 : vector<16x32xf32>
    %20 = math.tanh %12 : vector<16x32xf32>
    %21 = arith.mulf %19, %20 : vector<16x32xf32>
    %c0_12 = arith.constant 0 : index
    %22 = memref.load %arg1[%c0_12] : memref<8xf32, #tpu.memory_space<smem>>
    %23 = vector.broadcast %22 : f32 to vector<16x32xf32>
    %24 = arith.mulf %23, %21 : vector<16x32xf32>
    %25 = arith.addf %6, %24 : vector<16x32xf32>
    %26 = vector.extract_strided_slice %3 {offsets = [0, 4], sizes = [16, 4], strides = [1, 1]} : vector<16x32xf32> to vector<16x4xf32>
    %cst_13 = arith.constant dense<0.000000e+00> : vector<16x64xf32>
    %27 = tpu.matmul %26, %4, %cst_13 {dimension_numbers = #tpu.dot_dimension_numbers<[1], [0], [0], [1], [0, 0, 1, 1], [], []>} : vector<16x4xf32>, vector<4x64xf32>, vector<16x64xf32> -> vector<16x64xf32>
    %28 = vector.broadcast %5 : vector<1x64xf32> to vector<16x64xf32>
    %29 = arith.addf %27, %28 : vector<16x64xf32>
    %30 = vector.extract_strided_slice %29 {offsets = [0, 0], sizes = [16, 32], strides = [1, 1]} : vector<16x64xf32> to vector<16x32xf32>
    %31 = vector.extract_strided_slice %29 {offsets = [0, 32], sizes = [16, 32], strides = [1, 1]} : vector<16x64xf32> to vector<16x32xf32>
    %32 = arith.negf %30 : vector<16x32xf32>
    %33 = math.exp %32 : vector<16x32xf32>
    %cst_14 = arith.constant 1.000000e+00 : f32
    %34 = vector.broadcast %cst_14 : f32 to vector<16x32xf32>
    %35 = arith.addf %34, %33 : vector<16x32xf32>
    %36 = arith.divf %34, %35 : vector<16x32xf32>
    %cst_15 = arith.constant 1.000000e+00 : f32
    %37 = vector.broadcast %cst_15 : f32 to vector<16x32xf32>
    %38 = arith.subf %37, %36 : vector<16x32xf32>
    %39 = math.tanh %31 : vector<16x32xf32>
    %40 = arith.mulf %38, %39 : vector<16x32xf32>
    %c1 = arith.constant 1 : index
    %41 = memref.load %arg1[%c1] : memref<8xf32, #tpu.memory_space<smem>>
    %42 = vector.broadcast %41 : f32 to vector<16x32xf32>
    %43 = arith.mulf %42, %40 : vector<16x32xf32>
    %44 = arith.addf %25, %43 : vector<16x32xf32>
    %45 = vector.extract_strided_slice %3 {offsets = [0, 8], sizes = [16, 4], strides = [1, 1]} : vector<16x32xf32> to vector<16x4xf32>
    %cst_16 = arith.constant dense<0.000000e+00> : vector<16x64xf32>
    %46 = tpu.matmul %45, %4, %cst_16 {dimension_numbers = #tpu.dot_dimension_numbers<[1], [0], [0], [1], [0, 0, 1, 1], [], []>} : vector<16x4xf32>, vector<4x64xf32>, vector<16x64xf32> -> vector<16x64xf32>
    %47 = vector.broadcast %5 : vector<1x64xf32> to vector<16x64xf32>
    %48 = arith.addf %46, %47 : vector<16x64xf32>
    %49 = vector.extract_strided_slice %48 {offsets = [0, 0], sizes = [16, 32], strides = [1, 1]} : vector<16x64xf32> to vector<16x32xf32>
    %50 = vector.extract_strided_slice %48 {offsets = [0, 32], sizes = [16, 32], strides = [1, 1]} : vector<16x64xf32> to vector<16x32xf32>
    %51 = arith.negf %49 : vector<16x32xf32>
    %52 = math.exp %51 : vector<16x32xf32>
    %cst_17 = arith.constant 1.000000e+00 : f32
    %53 = vector.broadcast %cst_17 : f32 to vector<16x32xf32>
    %54 = arith.addf %53, %52 : vector<16x32xf32>
    %55 = arith.divf %53, %54 : vector<16x32xf32>
    %cst_18 = arith.constant 1.000000e+00 : f32
    %56 = vector.broadcast %cst_18 : f32 to vector<16x32xf32>
    %57 = arith.subf %56, %55 : vector<16x32xf32>
    %58 = math.tanh %50 : vector<16x32xf32>
    %59 = arith.mulf %57, %58 : vector<16x32xf32>
    %c2 = arith.constant 2 : index
    %60 = memref.load %arg1[%c2] : memref<8xf32, #tpu.memory_space<smem>>
    %61 = vector.broadcast %60 : f32 to vector<16x32xf32>
    %62 = arith.mulf %61, %59 : vector<16x32xf32>
    %63 = arith.addf %44, %62 : vector<16x32xf32>
    %64 = vector.extract_strided_slice %3 {offsets = [0, 12], sizes = [16, 4], strides = [1, 1]} : vector<16x32xf32> to vector<16x4xf32>
    %cst_19 = arith.constant dense<0.000000e+00> : vector<16x64xf32>
    %65 = tpu.matmul %64, %4, %cst_19 {dimension_numbers = #tpu.dot_dimension_numbers<[1], [0], [0], [1], [0, 0, 1, 1], [], []>} : vector<16x4xf32>, vector<4x64xf32>, vector<16x64xf32> -> vector<16x64xf32>
    %66 = vector.broadcast %5 : vector<1x64xf32> to vector<16x64xf32>
    %67 = arith.addf %65, %66 : vector<16x64xf32>
    %68 = vector.extract_strided_slice %67 {offsets = [0, 0], sizes = [16, 32], strides = [1, 1]} : vector<16x64xf32> to vector<16x32xf32>
    %69 = vector.extract_strided_slice %67 {offsets = [0, 32], sizes = [16, 32], strides = [1, 1]} : vector<16x64xf32> to vector<16x32xf32>
    %70 = arith.negf %68 : vector<16x32xf32>
    %71 = math.exp %70 : vector<16x32xf32>
    %cst_20 = arith.constant 1.000000e+00 : f32
    %72 = vector.broadcast %cst_20 : f32 to vector<16x32xf32>
    %73 = arith.addf %72, %71 : vector<16x32xf32>
    %74 = arith.divf %72, %73 : vector<16x32xf32>
    %cst_21 = arith.constant 1.000000e+00 : f32
    %75 = vector.broadcast %cst_21 : f32 to vector<16x32xf32>
    %76 = arith.subf %75, %74 : vector<16x32xf32>
    %77 = math.tanh %69 : vector<16x32xf32>
    %78 = arith.mulf %76, %77 : vector<16x32xf32>
    %c3 = arith.constant 3 : index
    %79 = memref.load %arg1[%c3] : memref<8xf32, #tpu.memory_space<smem>>
    %80 = vector.broadcast %79 : f32 to vector<16x32xf32>
    %81 = arith.mulf %80, %78 : vector<16x32xf32>
    %82 = arith.addf %63, %81 : vector<16x32xf32>
    %83 = vector.extract_strided_slice %3 {offsets = [0, 16], sizes = [16, 4], strides = [1, 1]} : vector<16x32xf32> to vector<16x4xf32>
    %cst_22 = arith.constant dense<0.000000e+00> : vector<16x64xf32>
    %84 = tpu.matmul %83, %4, %cst_22 {dimension_numbers = #tpu.dot_dimension_numbers<[1], [0], [0], [1], [0, 0, 1, 1], [], []>} : vector<16x4xf32>, vector<4x64xf32>, vector<16x64xf32> -> vector<16x64xf32>
    %85 = vector.broadcast %5 : vector<1x64xf32> to vector<16x64xf32>
    %86 = arith.addf %84, %85 : vector<16x64xf32>
    %87 = vector.extract_strided_slice %86 {offsets = [0, 0], sizes = [16, 32], strides = [1, 1]} : vector<16x64xf32> to vector<16x32xf32>
    %88 = vector.extract_strided_slice %86 {offsets = [0, 32], sizes = [16, 32], strides = [1, 1]} : vector<16x64xf32> to vector<16x32xf32>
    %89 = arith.negf %87 : vector<16x32xf32>
    %90 = math.exp %89 : vector<16x32xf32>
    %cst_23 = arith.constant 1.000000e+00 : f32
    %91 = vector.broadcast %cst_23 : f32 to vector<16x32xf32>
    %92 = arith.addf %91, %90 : vector<16x32xf32>
    %93 = arith.divf %91, %92 : vector<16x32xf32>
    %cst_24 = arith.constant 1.000000e+00 : f32
    %94 = vector.broadcast %cst_24 : f32 to vector<16x32xf32>
    %95 = arith.subf %94, %93 : vector<16x32xf32>
    %96 = math.tanh %88 : vector<16x32xf32>
    %97 = arith.mulf %95, %96 : vector<16x32xf32>
    %c4 = arith.constant 4 : index
    %98 = memref.load %arg1[%c4] : memref<8xf32, #tpu.memory_space<smem>>
    %99 = vector.broadcast %98 : f32 to vector<16x32xf32>
    %100 = arith.mulf %99, %97 : vector<16x32xf32>
    %101 = arith.addf %82, %100 : vector<16x32xf32>
    %102 = vector.extract_strided_slice %3 {offsets = [0, 20], sizes = [16, 4], strides = [1, 1]} : vector<16x32xf32> to vector<16x4xf32>
    %cst_25 = arith.constant dense<0.000000e+00> : vector<16x64xf32>
    %103 = tpu.matmul %102, %4, %cst_25 {dimension_numbers = #tpu.dot_dimension_numbers<[1], [0], [0], [1], [0, 0, 1, 1], [], []>} : vector<16x4xf32>, vector<4x64xf32>, vector<16x64xf32> -> vector<16x64xf32>
    %104 = vector.broadcast %5 : vector<1x64xf32> to vector<16x64xf32>
    %105 = arith.addf %103, %104 : vector<16x64xf32>
    %106 = vector.extract_strided_slice %105 {offsets = [0, 0], sizes = [16, 32], strides = [1, 1]} : vector<16x64xf32> to vector<16x32xf32>
    %107 = vector.extract_strided_slice %105 {offsets = [0, 32], sizes = [16, 32], strides = [1, 1]} : vector<16x64xf32> to vector<16x32xf32>
    %108 = arith.negf %106 : vector<16x32xf32>
    %109 = math.exp %108 : vector<16x32xf32>
    %cst_26 = arith.constant 1.000000e+00 : f32
    %110 = vector.broadcast %cst_26 : f32 to vector<16x32xf32>
    %111 = arith.addf %110, %109 : vector<16x32xf32>
    %112 = arith.divf %110, %111 : vector<16x32xf32>
    %cst_27 = arith.constant 1.000000e+00 : f32
    %113 = vector.broadcast %cst_27 : f32 to vector<16x32xf32>
    %114 = arith.subf %113, %112 : vector<16x32xf32>
    %115 = math.tanh %107 : vector<16x32xf32>
    %116 = arith.mulf %114, %115 : vector<16x32xf32>
    %c5 = arith.constant 5 : index
    %117 = memref.load %arg1[%c5] : memref<8xf32, #tpu.memory_space<smem>>
    %118 = vector.broadcast %117 : f32 to vector<16x32xf32>
    %119 = arith.mulf %118, %116 : vector<16x32xf32>
    %120 = arith.addf %101, %119 : vector<16x32xf32>
    %121 = vector.extract_strided_slice %3 {offsets = [0, 24], sizes = [16, 4], strides = [1, 1]} : vector<16x32xf32> to vector<16x4xf32>
    %cst_28 = arith.constant dense<0.000000e+00> : vector<16x64xf32>
    %122 = tpu.matmul %121, %4, %cst_28 {dimension_numbers = #tpu.dot_dimension_numbers<[1], [0], [0], [1], [0, 0, 1, 1], [], []>} : vector<16x4xf32>, vector<4x64xf32>, vector<16x64xf32> -> vector<16x64xf32>
    %123 = vector.broadcast %5 : vector<1x64xf32> to vector<16x64xf32>
    %124 = arith.addf %122, %123 : vector<16x64xf32>
    %125 = vector.extract_strided_slice %124 {offsets = [0, 0], sizes = [16, 32], strides = [1, 1]} : vector<16x64xf32> to vector<16x32xf32>
    %126 = vector.extract_strided_slice %124 {offsets = [0, 32], sizes = [16, 32], strides = [1, 1]} : vector<16x64xf32> to vector<16x32xf32>
    %127 = arith.negf %125 : vector<16x32xf32>
    %128 = math.exp %127 : vector<16x32xf32>
    %cst_29 = arith.constant 1.000000e+00 : f32
    %129 = vector.broadcast %cst_29 : f32 to vector<16x32xf32>
    %130 = arith.addf %129, %128 : vector<16x32xf32>
    %131 = arith.divf %129, %130 : vector<16x32xf32>
    %cst_30 = arith.constant 1.000000e+00 : f32
    %132 = vector.broadcast %cst_30 : f32 to vector<16x32xf32>
    %133 = arith.subf %132, %131 : vector<16x32xf32>
    %134 = math.tanh %126 : vector<16x32xf32>
    %135 = arith.mulf %133, %134 : vector<16x32xf32>
    %c6 = arith.constant 6 : index
    %136 = memref.load %arg1[%c6] : memref<8xf32, #tpu.memory_space<smem>>
    %137 = vector.broadcast %136 : f32 to vector<16x32xf32>
    %138 = arith.mulf %137, %135 : vector<16x32xf32>
    %139 = arith.addf %120, %138 : vector<16x32xf32>
    %140 = vector.extract_strided_slice %3 {offsets = [0, 28], sizes = [16, 4], strides = [1, 1]} : vector<16x32xf32> to vector<16x4xf32>
    %cst_31 = arith.constant dense<0.000000e+00> : vector<16x64xf32>
    %141 = tpu.matmul %140, %4, %cst_31 {dimension_numbers = #tpu.dot_dimension_numbers<[1], [0], [0], [1], [0, 0, 1, 1], [], []>} : vector<16x4xf32>, vector<4x64xf32>, vector<16x64xf32> -> vector<16x64xf32>
    %142 = vector.broadcast %5 : vector<1x64xf32> to vector<16x64xf32>
    %143 = arith.addf %141, %142 : vector<16x64xf32>
    %144 = vector.extract_strided_slice %143 {offsets = [0, 0], sizes = [16, 32], strides = [1, 1]} : vector<16x64xf32> to vector<16x32xf32>
    %145 = vector.extract_strided_slice %143 {offsets = [0, 32], sizes = [16, 32], strides = [1, 1]} : vector<16x64xf32> to vector<16x32xf32>
    %146 = arith.negf %144 : vector<16x32xf32>
    %147 = math.exp %146 : vector<16x32xf32>
    %cst_32 = arith.constant 1.000000e+00 : f32
    %148 = vector.broadcast %cst_32 : f32 to vector<16x32xf32>
    %149 = arith.addf %148, %147 : vector<16x32xf32>
    %150 = arith.divf %148, %149 : vector<16x32xf32>
    %cst_33 = arith.constant 1.000000e+00 : f32
    %151 = vector.broadcast %cst_33 : f32 to vector<16x32xf32>
    %152 = arith.subf %151, %150 : vector<16x32xf32>
    %153 = math.tanh %145 : vector<16x32xf32>
    %154 = arith.mulf %152, %153 : vector<16x32xf32>
    %c7 = arith.constant 7 : index
    %155 = memref.load %arg1[%c7] : memref<8xf32, #tpu.memory_space<smem>>
    %156 = vector.broadcast %155 : f32 to vector<16x32xf32>
    %157 = arith.mulf %156, %154 : vector<16x32xf32>
    %158 = arith.addf %139, %157 : vector<16x32xf32>
    %cst_34 = arith.constant 0.000000e+00 : f32
    %159 = vector.broadcast %cst_34 : f32 to vector<16x32xf32>
    %160 = arith.maximumf %158, %159 : vector<16x32xf32>
    %c0_35 = arith.constant 0 : index
    %c0_36 = arith.constant 0 : index
    %161 = vector.load %arg6[%c0_35, %c0_36] : memref<32x8xf32, #tpu.memory_space<vmem>>, vector<32x8xf32>
    %cst_37 = arith.constant dense<0.000000e+00> : vector<16x8xf32>
    %162 = tpu.matmul %160, %161, %cst_37 {dimension_numbers = #tpu.dot_dimension_numbers<[1], [0], [0], [1], [0, 0, 1, 1], [], []>} : vector<16x32xf32>, vector<32x8xf32>, vector<16x8xf32> -> vector<16x8xf32>
    %c0_38 = arith.constant 0 : index
    %c0_39 = arith.constant 0 : index
    %163 = vector.load %arg7[%c0_38, %c0_39] : memref<1x8xf32, #tpu.memory_space<vmem>>, vector<1x8xf32>
    %164 = vector.broadcast %163 : vector<1x8xf32> to vector<16x8xf32>
    %165 = arith.addf %162, %164 : vector<16x8xf32>
    %c0_40 = arith.constant 0 : index
    %c0_41 = arith.constant 0 : index
    %c0_42 = arith.constant 0 : index
    %166 = vector.load %arg8[%c0_40, %c0_41, %c0_42] : memref<1x16x8xf32, #tpu.memory_space<vmem>>, vector<1x16x8xf32>
    %167 = vector.shape_cast %166 : vector<1x16x8xf32> to vector<16x8xf32>
    %168 = vector.shape_cast %165 : vector<16x8xf32> to vector<1x16x8xf32>
    tpu.vector_store %arg8[%c0_40, %c0_41, %c0_42], %168 {strides = array<i32>} : memref<1x16x8xf32, #tpu.memory_space<vmem>>, vector<1x16x8xf32>,
    return
  }
  func.func @transform_0(%arg0: i32, %arg1: memref<8xf32, #tpu.memory_space<smem>>) -> (i32, i32, i32) {
    %c0_i32 = arith.constant 0 : i32
    %c0_i32_0 = arith.constant 0 : i32
    %c0_i32_1 = arith.constant 0 : i32
    return %arg0, %c0_i32, %c0_i32_0 : i32, i32, i32
  }
  func.func @transform_1(%arg0: i32, %arg1: memref<8xf32, #tpu.memory_space<smem>>) -> (i32, i32) {
    %c0_i32 = arith.constant 0 : i32
    %c0_i32_0 = arith.constant 0 : i32
    %c0_i32_1 = arith.constant 0 : i32
    return %c0_i32, %c0_i32_0 : i32, i32
  }
  func.func @transform_2(%arg0: i32, %arg1: memref<8xf32, #tpu.memory_space<smem>>) -> (i32, i32) {
    %c0_i32 = arith.constant 0 : i32
    %c0_i32_0 = arith.constant 0 : i32
    %c0_i32_1 = arith.constant 0 : i32
    return %c0_i32, %c0_i32_0 : i32, i32
  }
  func.func @transform_3(%arg0: i32, %arg1: memref<8xf32, #tpu.memory_space<smem>>) -> (i32, i32) {
    %c0_i32 = arith.constant 0 : i32
    %c0_i32_0 = arith.constant 0 : i32
    %c0_i32_1 = arith.constant 0 : i32
    return %c0_i32, %c0_i32_0 : i32, i32
  }
  func.func @transform_4(%arg0: i32, %arg1: memref<8xf32, #tpu.memory_space<smem>>) -> (i32, i32) {
    %c0_i32 = arith.constant 0 : i32
    %c0_i32_0 = arith.constant 0 : i32
    %c0_i32_1 = arith.constant 0 : i32
    return %c0_i32, %c0_i32_0 : i32, i32
  }
  func.func @transform_5(%arg0: i32, %arg1: memref<8xf32, #tpu.memory_space<smem>>) -> (i32, i32) {
    %c0_i32 = arith.constant 0 : i32
    %c0_i32_0 = arith.constant 0 : i32
    %c0_i32_1 = arith.constant 0 : i32
    return %c0_i32, %c0_i32_0 : i32, i32
  }
  func.func @transform_6(%arg0: i32, %arg1: memref<8xf32, #tpu.memory_space<smem>>) -> (i32, i32, i32) {
    %c0_i32 = arith.constant 0 : i32
    %c0_i32_0 = arith.constant 0 : i32
    %c0_i32_1 = arith.constant 0 : i32
    return %arg0, %c0_i32, %c0_i32_0 : i32, i32, i32
  }
}

</mosaic_0001>

<bundles_post_ra>
// kernel: tpu_custom_call.1
= control target key start
LH: loop header
LB: loop body
LE: loop exit
PB: predicated region body
PF: predicated region fallthrough
CT: control target
= control target key end

     0   :  { %s1970_s0 = inlined_call_operand.vmem [shape: f32[8], index: 0, kind: input, shape index: {}]   ;;  %s1971_s1 = inlined_call_operand.vmem [shape: bf16[2,16,32], index: 1, kind: input, shape index: {}]   ;;  %s1972_s2 = inlined_call_operand.vmem [shape: bf16[16,16], index: 2, kind: input, shape index: {}]   ;;  %s1973_s3 = inlined_call_operand.vmem [shape: f32[4,64], index: 3, kind: input, shape index: {}]   ;;  %s1974_s4 = inlined_call_operand.vmem [shape: f32[1,64], index: 4, kind: input, shape index: {}]   ;;  %s1975_s5 = inlined_call_operand.vmem [shape: f32[32,8], index: 5, kind: input, shape index: {}]   ;;  %s1976_s6 = inlined_call_operand.vmem [shape: f32[1,8], index: 6, kind: input, shape index: {}]   ;;  %s1977_s7 = inlined_call_operand.vmem [shape: f32[2,16,8], index: 7, kind: output, shape index: {}]  }
   0x1   :  { %s12_s26 = sshll.u32 %s1970_s0, 4  ;;  %s13_s26 = int_to_ptr.vmem [resolvable:$true] %s12_s26 }
   0x2   :  { %s1677_s27 = scalar_lea.vmem %s13_s26, 16  ;;  %p1682_p1 = scmp.lt.s32.totalorder %s13_s26, %s13_s26 }
   0x3   :  { %p1678_p0 = scmp.ne.s32.totalorder %s13_s26, %s1677_s27  ;;  %p1683_p2 = scmp.lt.s32.totalorder %s1677_s27, %s1677_s27 }
   0x5   :  { %p1684_p3 = por %p1683_p2, %p1682_p1 }
   0x7   :  { %p1685_p4 = pnand %p1684_p3, %p1678_p0 }
   0x9   :  { %1688 = shalt.err (!%p1685_p4)  }
   0xa   :  { %s1699_s28 = smov [#allocation3]  }
   0xb   :  { %15 = dma.vmem_to_smem %s13_s26, 16, %s1699_s28, [#allocation2] }
   0xc   :  { %1693 = dma.done.wait [#allocation2], 16 }
   0xd   :  { %1694 = vsyncadd [#allocation2], 4294967280 }
   0xe   :  { %17 = sfence }
   0xf   :  { %s1753_s29 = smov 0  }
  0x10 LB: > { %s1404_s0 = sadd.s32 4294967295, %s1697_s29   ;;  %p1408_p5 = scmp.ge.s32.totalorder %s1697_s29, 1  ;;  %s1697_s29 = sphi %s1753_s29, %s23_s29  }
  0x11   : > { %p219_p6 = scmp.lt.s32.totalorder %s1697_s29, 3 }
  0x13   : > { %p220_p7 = pnand %p1408_p5, %p219_p6 }
  0x14   : > { %p249_p8 = scmp.lt.s32.totalorder (!%p220_p7), %s1404_s0, 1  ;;  %s1702_s15 = smov (!%p220_p7), 120  }
  0x15   : > { %223 = sbr.rel (%p220_p7) target bundleno = 907 (0x38b), region = 44  ;;  %s1703_s16 = smov (!%p220_p7), 124  }
  0x16   : > { %s1704_s17 = smov (!%p220_p7), 116   ;;  %s1705_s18 = smov (!%p220_p7), 112  }
  0x17   : > { %s1706_s19 = smov (!%p220_p7), 108   ;;  %s1707_s20 = smov (!%p220_p7), 104  }
  0x18   : > { %s1708_s21 = smov (!%p220_p7), 100   ;;  %s1709_s24 = smov (!%p220_p7), 96  }
  0x19   : > { %s1936_s11 = sld [smem:[#allocation3]] (!%p220_p7) }
  0x1a   : > { %v1700_v0 = vmov 0.0   ;;  %vm1701_vm0 = vmmov 0   ;;  %s1979_s0 = smov (!%p249_p8, %s1404_s0), 1  ;;  %v1580_v2 = vld [vmem:[%s1972_s2] sm:$0xff]   ;;  %vm275_vm1 = vcmask 130048   ;;  %vm335_vm2 = vcmask 1043456  }
  0x1b   : > { %1503 = vmatprep.subr.bf16.mxu0 %v1700_v0  ;;  %1505 = vmatprep.mubr.msk.bf16.mxu0 %vm1701_vm0, %v1700_v0  ;;  %s1469_s30 = sshll.u32 %s1979_s0, 3  ;;  %v1773_v3 = vld [vmem:[%s1973_s3] sm:$0xf]  ;;  %vm328_vm3 = vcmask 31744   ;;  %s1938_s12 = sld [smem:[#allocation3 + $0x1]]  ;;  %vm1264_vm4 = vcmask 261120  }
  0x1c   : > { %s253_s10 = scalar_lea.vmem %s1971_s1, %s1469_s30  ;;  %1514 = vmatprep.subr.msk.mxu1 %vm335_vm2, %v1773_v3  ;;  %v1826_v22 = vld [vmem:[%s1974_s4] ss:$0 sm:$0xff]  ;;  %s1942_s13 = sld [smem:[#allocation3 + $0x2]]  ;;  %vm1346_vm5 = vcmask 64512  }
  0x1d   : > { %v1579_v1 = vld [vmem:[%s253_s10] sm:$0xff]   ;;  %1515 = vmatpush3.msk.msra.mxu1 %vm335_vm2, %v1773_v3  ;;  %s1944_s14 = sld [smem:[#allocation3 + $0x3]] }
  0x1e   : > { %1504 = vmatpush3.bf16.msra.mxu0 %v1579_v1  ;;  %1519 = vmatprep.subr.msk.mxu1 %vm335_vm2, %v1773_v3 }
  0x1f   : > { %1509 = vmatprep.subr.msk.mxu0 %vm335_vm2, %v1773_v3 }
  0x21   : > { %1506 = vmatmul.mubr.msk.bf16.vlgmr.msra.gmra.mxu0 %vm275_vm1, %v1580_v2 }
  0x22   : > { %1510 = vmatpush3.msk.msra.mxu0 %vm335_vm2, %v1773_v3 }
  0x23   : > { %1524 = vmatprep.subr.msk.mxu0 %vm335_vm2, %v1773_v3 }
  0xe1   : > { %v313_v4 = vpop.f32.mrf.mxu0 }
  0xe2   : > { %561 = vrot.lane.b32.xlu1 %v313_v4, %s1702_s15  ;;  %446 = vrot.lane.b32.xlu0 %v313_v4, %s1703_s16 }
  0xe3   : > { %1511 = vmatprep.mubr.msk.f32.mxu0 %vm328_vm3, %v313_v4  ;;  %v1507_v5 = vpop.f32.mrf.mxu0 }
  0xe4   : > { %v1255_v5 = vld [vmem:[%s1975_s5 + $0x10] sm:$0xff] }
  0xe5   : > { %v316_v6 = vpop.f32.mrf.mxu0 }
  0xe6   : > { %676 = vrot.lane.b32.xlu0 %v313_v4, %s1704_s17  ;;  %563 = vrot.lane.b32.xlu1 %v316_v6, %s1702_s15  ;;  %s1948_s15 = sld [smem:[#allocation3 + $0x4]] }
  0xe7   : > { %1512 = vmatmul.mubr.msk.f32.vlgmr.msra.gmra.mxu0 %vm328_vm3, %v316_v6  ;;  %v1508_v7 = vpop.f32.mrf.mxu0 }
  0xe8   : > { %1525 = vmatpush3.msk.msra.mxu0 %vm335_vm2, %v1773_v3  ;;  %v1254_v7 = vld [vmem:[%s1975_s5 + $0x8] sm:$0xff] }
  0xe9   : > { %1534 = vmatprep.subr.msk.mxu0 %vm335_vm2, %v1773_v3 }
  0xea   : > { %678 = vrot.lane.b32.xlu1 %v316_v6, %s1704_s17  ;;  %448 = vrot.lane.b32.xlu0 %v316_v6, %s1703_s16  ;;  %s1950_s16 = sld [smem:[#allocation3 + $0x5]] }
  0xeb   : > { %s1952_s17 = sld [smem:[#allocation3 + $0x6]] }
  0xee   : > { %793 = vrot.lane.b32.xlu1 %v316_v6, %s1705_s18  ;;  %791 = vrot.lane.b32.xlu0 %v313_v4, %s1705_s18  ;;  %s1955_s18 = sld [smem:[#allocation3 + $0x7]] }
  0xf2   : > { %908 = vrot.lane.b32.xlu1 %v316_v6, %s1706_s19  ;;  %906 = vrot.lane.b32.xlu0 %v313_v4, %s1706_s19  ;;  %s1470_s19 = sshll.u32 %s1979_s0, 4 }
  0xf6   : > { %1023 = vrot.lane.b32.xlu1 %v316_v6, %s1707_s20  ;;  %1021 = vrot.lane.b32.xlu0 %v313_v4, %s1707_s20 }
  0xfa   : > { %1138 = vrot.lane.b32.xlu1 %v316_v6, %s1708_s21  ;;  %1136 = vrot.lane.b32.xlu0 %v313_v4, %s1708_s21  ;;  %v1256_v4 = vld [vmem:[%s1975_s5 + $0x18] sm:$0xff] }
 0x154   : > { %v562_v8 = vpop.permute.xlu1 %561  ;;  %v447_v9 = vpop.permute.xlu0 %446 }
 0x155   : > { %1516 = vmatprep.mubr.msk.f32.mxu1 %vm328_vm3, %v447_v9  ;;  %v1253_v9 = vld [vmem:[%s1975_s5] sm:$0xff] }
 0x158   : > { %v677_v10 = vpop.permute.xlu0 %676  ;;  %v564_v11 = vpop.permute.xlu1 %563 }
 0x159   : > { %1526 = vmatprep.mubr.msk.f32.mxu0 %vm328_vm3, %v677_v10 }
 0x15c   : > { %v679_v12 = vpop.permute.xlu1 %678  ;;  %v449_v13 = vpop.permute.xlu0 %448 }
 0x15d   : > { %1517 = vmatmul.mubr.msk.f32.vlgmr.msra.gmra.mxu1 %vm328_vm3, %v449_v13  ;;  %1527 = vmatmul.mubr.msk.f32.vlgmr.msra.gmra.mxu0 %vm328_vm3, %v679_v12 }
 0x15e   : > { %1521 = vmatprep.mubr.msk.f32.mxu1 %vm328_vm3, %v562_v8  ;;  %1520 = vmatpush3.msk.msra.mxu1 %vm335_vm2, %v1773_v3 }
 0x15f   : > { %1529 = vmatprep.subr.msk.mxu1 %vm335_vm2, %v1773_v3  ;;  %1535 = vmatpush3.msk.msra.mxu0 %vm335_vm2, %v1773_v3 }
 0x160   : > { %v794_v14 = vpop.permute.xlu1 %793  ;;  %v792_v15 = vpop.permute.xlu0 %791  ;;  %1544 = vmatprep.subr.msk.mxu0 %vm335_vm2, %v1773_v3 }
 0x161   : > { %1522 = vmatmul.mubr.msk.f32.vlgmr.msra.gmra.mxu1 %vm328_vm3, %v564_v11 }
 0x162   : > { %1531 = vmatprep.mubr.msk.f32.mxu1 %vm328_vm3, %v792_v15  ;;  %1530 = vmatpush3.msk.msra.mxu1 %vm335_vm2, %v1773_v3 }
 0x163   : > { %1539 = vmatprep.subr.msk.mxu1 %vm335_vm2, %v1773_v3 }
 0x164   : > { %v909_v16 = vpop.permute.xlu1 %908  ;;  %v907_v17 = vpop.permute.xlu0 %906 }
 0x165   : > { %1532 = vmatmul.mubr.msk.f32.vlgmr.msra.gmra.mxu1 %vm328_vm3, %v794_v14  ;;  %1536 = vmatprep.mubr.msk.f32.mxu0 %vm328_vm3, %v907_v17 }
 0x166   : > { %1537 = vmatmul.mubr.msk.f32.vlgmr.msra.gmra.mxu0 %vm328_vm3, %v909_v16  ;;  %1540 = vmatpush3.msk.msra.mxu1 %vm335_vm2, %v1773_v3 }
 0x167   : > { %1545 = vmatpush3.msk.msra.mxu0 %vm335_vm2, %v1773_v3  ;;  %1549 = vmatprep.subr.mxu1 %v1256_v4 }
 0x168   : > { %v1024_v18 = vpop.permute.xlu1 %1023  ;;  %v1022_v19 = vpop.permute.xlu0 %1021 }
 0x169   : > { %1541 = vmatprep.mubr.msk.f32.mxu1 %vm328_vm3, %v1022_v19 }
 0x16a   : > { %1542 = vmatmul.mubr.msk.f32.vlgmr.msra.gmra.mxu1 %vm328_vm3, %v1024_v18 }
 0x16b   : > { %1550 = vmatpush3.msra.mxu1 %v1256_v4 }
 0x16c   : > { %v1139_v20 = vpop.permute.xlu1 %1138  ;;  %v1137_v21 = vpop.permute.xlu0 %1136  ;;  %1551 = vmatprep.subr.mxu1 %v1255_v5 }
 0x16d   : > { %1546 = vmatprep.mubr.msk.f32.mxu0 %vm328_vm3, %v1137_v21  ;;  %1552 = vmatpush3.msra.mxu1 %v1255_v5 }
 0x16e   : > { %1547 = vmatmul.mubr.msk.f32.vlgmr.msra.gmra.mxu0 %vm328_vm3, %v1139_v20  ;;  %1553 = vmatprep.subr.mxu1 %v1254_v7 }
 0x16f   : > { %1554 = vmatpush3.msra.mxu1 %v1254_v7 }
 0x170   : > { %1555 = vmatprep.subr.mxu1 %v1253_v9 }
 0x171   : > { %1556 = vmatpush3.msra.mxu1 %v1253_v9 }
 0x1a7   : > { %v1513_v23 = vpop.f32.mrf.mxu0 }
 0x1a8   : > { %v1829_v24 = vadd.f32 %v1513_v23, %v1826_v22 }
 0x1a9   : > { %v405_v25 = vpop.f32.mrf.mxu0 }
 0x1aa   : > { %1581 = vtanh.f32 %v1829_v24  ;;  %v1833_v26 = vadd.f32 %v1826_v22, %v405_v25  ;;  %v1421_v11 = vmul.f32 -1.442695, %v1829_v24 }
 0x1ac   : > { %1583 = vtanh.f32 %v1833_v26  ;;  %v1420_v13 = vmul.f32 -1.442695, %v1833_v26 }
 0x1b7   : > { %v1582_v27 = vpop.eup %1581 }
 0x1b8   : > { %434 = vrot.lane.b32.xlu0 %v1582_v27, %s1709_s24 }
 0x1b9   : > { %v1584_v28 = vpop.eup %1583 }
 0x1bc   : > { %432 = vrot.lane.b32.xlu0 %v1584_v28, %s1709_s24 }
 0x21d   : > { %v1518_v29 = vpop.f32.mrf.mxu1  ;;  %v1528_v30 = vpop.f32.mrf.mxu0 }
 0x21e   : > { %v1839_v31 = vadd.f32 %v1518_v29, %v1826_v22  ;;  %v1843_v33 = vadd.f32 %v1528_v30, %v1826_v22 }
 0x21f   : > { %v520_v32 = vpop.f32.mrf.mxu1  ;;  %v750_v34 = vpop.f32.mrf.mxu0 }
 0x220   : > { %1585 = vtanh.f32 %v1839_v31  ;;  %v1846_v36 = vadd.f32 %v1826_v22, %v750_v34  ;;  %v1850_v37 = vadd.f32 %v1826_v22, %v520_v32  ;;  %v1426_v12 = vmul.f32 -1.442695, %v1839_v31 }
 0x221   : > { %v1523_v35 = vpop.f32.mrf.mxu1  ;;  %1587 = vtanh.f32 %v1843_v33  ;;  %v1438_v16 = vmul.f32 -1.442695, %v1843_v33 }
 0x222   : > { %1589 = vtanh.f32 %v1846_v36  ;;  %v1858_v40 = vadd.f32 %v1523_v35, %v1826_v22  ;;  %v1425_v14 = vmul.f32 -1.442695, %v1850_v37  ;;  %v1437_v15 = vmul.f32 -1.442695, %v1846_v36 }
 0x223   : > { %v635_v38 = vpop.f32.mrf.mxu1  ;;  %1591 = vtanh.f32 %v1850_v37 }
 0x224   : > { %v1854_v39 = vadd.f32 %v1826_v22, %v635_v38  ;;  %v1432_v18 = vmul.f32 -1.442695, %v1858_v40 }
 0x225   : > { %v1533_v41 = vpop.f32.mrf.mxu1 }
 0x226   : > { %v1538_v42 = vpop.f32.mrf.mxu0  ;;  %1593 = vtanh.f32 %v1854_v39  ;;  %v1870_v48 = vadd.f32 %v1533_v41, %v1826_v22  ;;  %v1431_v17 = vmul.f32 -1.442695, %v1854_v39 }
 0x227   : > { %1595 = vtanh.f32 %v1858_v40  ;;  %v1863_v43 = vadd.f32 %v1538_v42, %v1826_v22  ;;  %v865_v44 = vpop.f32.mrf.mxu1 }
 0x228   : > { %v980_v45 = vpop.f32.mrf.mxu0  ;;  %v1875_v51 = vadd.f32 %v1826_v22, %v865_v44  ;;  %v1444_v23 = vmul.f32 -1.442695, %v1870_v48 }
 0x229   : > { %v1867_v47 = vadd.f32 %v1826_v22, %v980_v45  ;;  %1597 = vtanh.f32 %v1863_v43  ;;  %v1450_v24 = vmul.f32 -1.442695, %v1863_v43 }
 0x22a   : > { %v1543_v49 = vpop.f32.mrf.mxu1  ;;  %v1443_v28 = vmul.f32 -1.442695, %v1875_v51 }
 0x22b   : > { %1599 = vtanh.f32 %v1867_v47  ;;  %v1880_v53 = vadd.f32 %v1543_v49, %v1826_v22  ;;  %v1449_v27 = vmul.f32 -1.442695, %v1867_v47  ;;  %v435_v47 = vpop.permute.xlu0 %434 }
 0x22c   : > { %1601 = vtanh.f32 %v1870_v48  ;;  %v1095_v54 = vpop.f32.mrf.mxu1 }
 0x22d   : > { %v1586_v46 = vpop.eup %1585  ;;  %1603 = vtanh.f32 %v1875_v51  ;;  %v1886_v57 = vadd.f32 %v1826_v22, %v1095_v54  ;;  %v1456_v29 = vmul.f32 -1.442695, %v1880_v53 }
 0x22e   : > { %549 = vrot.lane.b32.xlu1 %v1586_v46, %s1709_s24  ;;  %v1588_v50 = vpop.eup %1587  ;;  %v1548_v55 = vpop.f32.mrf.mxu0  ;;  %1605 = vtanh.f32 %v1880_v53 }
 0x22f   : > { %v1590_v52 = vpop.eup %1589  ;;  %v1890_v59 = vadd.f32 %v1548_v55, %v1826_v22  ;;  %1607 = vtanh.f32 %v1886_v57  ;;  %v1455_v31 = vmul.f32 -1.442695, %v1886_v57  ;;  %v441_v57 = vstv %s1936_s11 }
 0x230   : > { %v1592_v56 = vpop.eup %1591  ;;  %777 = vrot.lane.b32.xlu0 %v1590_v52, %s1709_s24  ;;  %v1210_v60 = vpop.f32.mrf.mxu0 }
 0x231   : > { %v1896_v62 = vadd.f32 %v1826_v22, %v1210_v60  ;;  %1609 = vtanh.f32 %v1890_v59  ;;  %v1462_v33 = vmul.f32 -1.442695, %v1890_v59 }
 0x232   : > { %779 = vrot.lane.b32.xlu1 %v1588_v50, %s1709_s24 }
 0x233   : > { %v1594_v58 = vpop.eup %1593  ;;  %1611 = vtanh.f32 %v1896_v62  ;;  %v1461_v35 = vmul.f32 -1.442695, %v1896_v62 }
 0x234   : > { %v1596_v61 = vpop.eup %1595  ;;  %662 = vrot.lane.b32.xlu0 %v1594_v58, %s1709_s24  ;;  %1613 = vpow2.f32 %v1421_v11  ;;  %v556_v58 = vstv %s1938_s12 }
 0x235   : > { %1615 = vpow2.f32 %v1426_v12 }
 0x236   : > { %547 = vrot.lane.b32.xlu1 %v1592_v56, %s1709_s24  ;;  %v1598_v63 = vpop.eup %1597  ;;  %1617 = vpow2.f32 %v1420_v13 }
 0x237   : > { %1619 = vpow2.f32 %v1425_v14 }
 0x238   : > { %v1600_v0 = vpop.eup %1599  ;;  %1621 = vpow2.f32 %v1437_v15 }
 0x239   : > { %v1602_v1 = vpop.eup %1601  ;;  %1007 = vrot.lane.b32.xlu0 %v1600_v0, %s1709_s24  ;;  %1623 = vpow2.f32 %v1438_v16  ;;  %v433_v0 = vpop.permute.xlu0 %432 }
 0x23a   : > { %664 = vrot.lane.b32.xlu1 %v1596_v61, %s1709_s24  ;;  %v1604_v2 = vpop.eup %1603  ;;  %1625 = vpow2.f32 %v1431_v17 }
 0x23b   : > { %v1606_v3 = vpop.eup %1605  ;;  %1627 = vpow2.f32 %v1432_v18 }
 0x23c   : > { %v1608_v6 = vpop.eup %1607 }
 0x23d   : > { %892 = vrot.lane.b32.xlu0 %v1604_v2, %s1709_s24 }
 0x23e   : > { %1009 = vrot.lane.b32.xlu1 %v1598_v63, %s1709_s24  ;;  %v1610_v8 = vpop.eup %1609 }
 0x240   : > { %v1612_v10 = vpop.eup %1611 }
 0x241   : > { %1122 = vrot.lane.b32.xlu0 %v1608_v6, %s1709_s24  ;;  %v1614_v19 = vpop.eup %1613 }
 0x242   : > { %894 = vrot.lane.b32.xlu1 %v1602_v1, %s1709_s24  ;;  %v1616_v20 = vpop.eup %1615  ;;  %v421_v21 = vadd.f32 1.0, %v1614_v19 }
 0x243   : > { %v1618_v22 = vpop.eup %1617  ;;  %v536_v25 = vadd.f32 1.0, %v1616_v20 }
 0x244   : > { %1629 = vrcp.f32 %v421_v21  ;;  %v420_v26 = vadd.f32 1.0, %v1618_v22  ;;  %v1620_v30 = vpop.eup %1619  ;;  %v671_v21 = vstv %s1942_s13 }
 0x245   : > { %1237 = vrot.lane.b32.xlu0 %v1612_v10, %s1709_s24  ;;  %1631 = vpow2.f32 %v1444_v23  ;;  %v1622_v32 = vpop.eup %1621  ;;  %v535_v37 = vadd.f32 1.0, %v1620_v30 }
 0x246   : > { %1124 = vrot.lane.b32.xlu1 %v1606_v3, %s1709_s24  ;;  %1633 = vpow2.f32 %v1450_v24  ;;  %v1624_v34 = vpop.eup %1623  ;;  %v765_v39 = vadd.f32 1.0, %v1622_v32 }
 0x247   : > { %1635 = vrcp.f32 %v536_v25  ;;  %v1626_v36 = vpop.eup %1625  ;;  %v766_v40 = vadd.f32 1.0, %v1624_v34 }
 0x248   : > { %1637 = vrcp.f32 %v420_v26  ;;  %v1628_v38 = vpop.eup %1627  ;;  %v650_v41 = vadd.f32 1.0, %v1626_v36 }
 0x249   : > { %1639 = vpow2.f32 %v1449_v27  ;;  %v651_v42 = vadd.f32 1.0, %v1628_v38 }
 0x24a   : > { %1239 = vrot.lane.b32.xlu1 %v1610_v8, %s1709_s24  ;;  %1641 = vpow2.f32 %v1443_v28  ;;  %s258_s24 = scalar_lea.vmem %s1977_s7, %s1470_s19 }
 0x24b   : > { %1643 = vpow2.f32 %v1456_v29 }
 0x24c   : > { %1645 = vpow2.f32 %v1455_v31 }
 0x24d   : > { %1647 = vpow2.f32 %v1462_v33  ;;  %v786_v33 = vstv %s1944_s14 }
 0x24e   : > { %1649 = vpow2.f32 %v1461_v35 }
 0x24f   : > { %1651 = vrcp.f32 %v535_v37 }
 0x250   : > { %1653 = vrcp.f32 %v765_v39 }
 0x251   : > { %v1630_v43 = vpop.eup %1629  ;;  %1655 = vrcp.f32 %v766_v40 }
 0x252   : > { %v1632_v44 = vpop.eup %1631  ;;  %1657 = vrcp.f32 %v650_v41  ;;  %v427_v49 = vsub.f32 1.0, %v1630_v43 }
 0x253   : > { %v1634_v45 = vpop.eup %1633  ;;  %1659 = vrcp.f32 %v651_v42  ;;  %v881_v55 = vadd.f32 1.0, %v1632_v44 }
 0x254   : > { %v1636_v46 = vpop.eup %1635  ;;  %v996_v51 = vadd.f32 1.0, %v1634_v45  ;;  %v439_v53 = vmul.f32 %v435_v47, %v427_v49 }
 0x255   : > { %v1638_v48 = vpop.eup %1637  ;;  %v542_v54 = vsub.f32 1.0, %v1636_v46 }
 0x256   : > { %v1640_v50 = vpop.eup %1639  ;;  %v426_v1 = vsub.f32 1.0, %v1638_v48  ;;  %1661 = vrcp.f32 %v996_v51  ;;  %v443_v4 = vmul.f32 %v441_v57, %v439_v53 }
 0x257   : > { %v1642_v52 = vpop.eup %1641  ;;  %v995_v62 = vadd.f32 1.0, %v1640_v50  ;;  %1663 = vrcp.f32 %v881_v55 }
 0x258   : > { %v1644_v56 = vpop.eup %1643  ;;  %v880_v2 = vadd.f32 1.0, %v1642_v52  ;;  %v438_v10 = vmul.f32 %v433_v0, %v426_v1  ;;  %v1016_v1 = vstv %s1950_s16 }
 0x259   : > { %v1646_v60 = vpop.eup %1645  ;;  %v1111_v6 = vadd.f32 1.0, %v1644_v56  ;;  %1665 = vrcp.f32 %v995_v62 }
 0x25a   : > { %v1648_v63 = vpop.eup %1647  ;;  %1667 = vrcp.f32 %v880_v2  ;;  %v1110_v13 = vadd.f32 1.0, %v1646_v60  ;;  %v442_v20 = vmul.f32 %v441_v57, %v438_v10  ;;  %v1131_v10 = vstv %s1952_s17 }
 0x25b   : > { %v1650_v3 = vpop.eup %1649  ;;  %1669 = vrcp.f32 %v1111_v6  ;;  %v1226_v17 = vadd.f32 1.0, %v1648_v63 }
 0x25c   : > { %v1652_v7 = vpop.eup %1651  ;;  %1671 = vrcp.f32 %v1110_v13  ;;  %v1225_v25 = vadd.f32 1.0, %v1650_v3 }
 0x25d   : > { %v1654_v9 = vpop.eup %1653  ;;  %v541_v16 = vsub.f32 1.0, %v1652_v7  ;;  %1673 = vrcp.f32 %v1226_v17 }
 0x25e   : > { %v1656_v12 = vpop.eup %1655  ;;  %v771_v23 = vsub.f32 1.0, %v1654_v9  ;;  %1675 = vrcp.f32 %v1225_v25  ;;  %v1246_v25 = vstv %s1955_s18 }
 0x25f   : > { %v1658_v14 = vpop.eup %1657  ;;  %v772_v26 = vsub.f32 1.0, %v1656_v12 }
 0x260   : > { %v1660_v18 = vpop.eup %1659  ;;  %v656_v24 = vsub.f32 1.0, %v1658_v14 }
 0x261   : > { %v657_v29 = vsub.f32 1.0, %v1660_v18 }
 0x263   : > { %v1662_v38 = vpop.eup %1661 }
 0x264   : > { %v1664_v40 = vpop.eup %1663  ;;  %v1002_v50 = vsub.f32 1.0, %v1662_v38 }
 0x265   : > { %v887_v52 = vsub.f32 1.0, %v1664_v40 }
 0x266   : > { %v1666_v46 = vpop.eup %1665 }
 0x267   : > { %v1668_v48 = vpop.eup %1667  ;;  %v1001_v57 = vsub.f32 1.0, %v1666_v46 }
 0x268   : > { %v1670_v53 = vpop.eup %1669 }
 0x269   : > { %v1672_v60 = vpop.eup %1671  ;;  %v1117_v63 = vsub.f32 1.0, %v1670_v53 }
 0x26a   : > { %v1674_v0 = vpop.eup %1673  ;;  %v1116_v9 = vsub.f32 1.0, %v1672_v60 }
 0x2a0   : > { %v550_v59 = vpop.permute.xlu1 %549 }
 0x2a1   : > { %v554_v61 = vmul.f32 %v550_v59, %v542_v54  ;;  %v901_v59 = vstv %s1948_s15 }
 0x2a2   : > { %v778_v15 = vpop.permute.xlu0 %777 }
 0x2a3   : > { %v558_v5 = vmul.f32 %v556_v58, %v554_v61  ;;  %v783_v30 = vmul.f32 %v778_v15, %v771_v23  ;;  %v1232_v15 = vsub.f32 1.0, %v1674_v0 }
 0x2a4   : > { %v780_v8 = vpop.permute.xlu1 %779 }
 0x2a5   : > { %v560_v11 = vadd.f32 %v558_v5, %v443_v4  ;;  %v784_v34 = vmul.f32 %v780_v8, %v772_v26  ;;  %v787_v41 = vmul.f32 %v786_v33, %v783_v30 }
 0x2a6   : > { %v663_v27 = vpop.permute.xlu0 %662 }
 0x2a7   : > { %v668_v31 = vmul.f32 %v663_v27, %v656_v24  ;;  %v788_v44 = vmul.f32 %v786_v33, %v784_v34 }
 0x2a8   : > { %v548_v19 = vpop.permute.xlu1 %547 }
 0x2a9   : > { %v553_v22 = vmul.f32 %v548_v19, %v541_v16  ;;  %v672_v37 = vmul.f32 %v671_v21, %v668_v31 }
 0x2ab   : > { %v557_v28 = vmul.f32 %v556_v58, %v553_v22  ;;  %v1008_v49 = vpop.permute.xlu0 %1007  ;;  %v886_v58 = vsub.f32 1.0, %v1668_v48 }
 0x2ac   : > { %v665_v32 = vpop.permute.xlu1 %664  ;;  %v1013_v2 = vmul.f32 %v1008_v49, %v1001_v57 }
 0x2ad   : > { %v559_v35 = vadd.f32 %v557_v28, %v442_v20  ;;  %v669_v36 = vmul.f32 %v665_v32, %v657_v29 }
 0x2ae   : > { %v1017_v16 = vmul.f32 %v1016_v1, %v1013_v2 }
 0x2af   : > { %v673_v39 = vmul.f32 %v671_v21, %v669_v36  ;;  %v674_v42 = vadd.f32 %v672_v37, %v559_v35  ;;  %v893_v61 = vpop.permute.xlu0 %892  ;;  %v1464_v35 = vld [vmem:[%s1976_s6] ss:$0 sm:$0xff] }
 0x2b0   : > { %v1010_v43 = vpop.permute.xlu1 %1009  ;;  %v898_v3 = vmul.f32 %v893_v61, %v886_v58 }
 0x2b1   : > { %v675_v45 = vadd.f32 %v673_v39, %v560_v11  ;;  %v789_v47 = vadd.f32 %v787_v41, %v674_v42  ;;  %v1014_v55 = vmul.f32 %v1010_v43, %v1002_v50  ;;  %v1676_v11 = vpop.eup %1675 }
 0x2b2   : > { %v902_v8 = vmul.f32 %v901_v59, %v898_v3  ;;  %v1231_v24 = vsub.f32 1.0, %v1676_v11 }
 0x2b3   : > { %v790_v51 = vadd.f32 %v788_v44, %v675_v45  ;;  %v1018_v5 = vmul.f32 %v1016_v1, %v1014_v55  ;;  %v1123_v12 = vpop.permute.xlu0 %1122 }
 0x2b4   : > { %v895_v54 = vpop.permute.xlu1 %894  ;;  %v904_v17 = vadd.f32 %v902_v8, %v789_v47  ;;  %v1128_v18 = vmul.f32 %v1123_v12, %v1116_v9 }
 0x2b5   : > { %v899_v56 = vmul.f32 %v895_v54, %v887_v52 }
 0x2b6   : > { %v1019_v22 = vadd.f32 %v1017_v16, %v904_v17  ;;  %v1132_v23 = vmul.f32 %v1131_v10, %v1128_v18 }
 0x2b7   : > { %v903_v62 = vmul.f32 %v901_v59, %v899_v56  ;;  %v1238_v26 = vpop.permute.xlu0 %1237 }
 0x2b8   : > { %v1125_v4 = vpop.permute.xlu1 %1124  ;;  %v1134_v28 = vadd.f32 %v1132_v23, %v1019_v22  ;;  %v1243_v29 = vmul.f32 %v1238_v26, %v1231_v24 }
 0x2b9   : > { %v905_v6 = vadd.f32 %v903_v62, %v790_v51  ;;  %v1129_v7 = vmul.f32 %v1125_v4, %v1117_v63 }
 0x2ba   : > { %v1247_v31 = vmul.f32 %v1246_v25, %v1243_v29 }
 0x2bb   : > { %v1020_v13 = vadd.f32 %v1018_v5, %v905_v6  ;;  %v1133_v14 = vmul.f32 %v1131_v10, %v1129_v7 }
 0x2bc   : > { %v1240_v19 = vpop.permute.xlu1 %1239  ;;  %v1249_v32 = vadd.f32 %v1247_v31, %v1134_v28 }
 0x2bd   : > { %v1135_v20 = vadd.f32 %v1133_v14, %v1020_v13  ;;  %v1244_v21 = vmul.f32 %v1240_v19, %v1232_v15 }
 0x2be   : > { %v1251_v34 = vmax.f32 %v1249_v32, 0.0 }
 0x2bf   : > { %v1248_v27 = vmul.f32 %v1246_v25, %v1244_v21 }
 0x2c0   : > { %1557 = vmatprep.mubr.msk.f32.mxu1 %vm1264_vm4, %v1251_v34 }
 0x2c1   : > { %v1250_v30 = vadd.f32 %v1248_v27, %v1135_v20 }
 0x2c3   : > { %v1252_v33 = vmax.f32 %v1250_v30, 0.0 }
 0x2c5   : > { %1558 = vmatmul.mubr.msk.f32.vlgmr.msra.gmra.mxu1 %vm1264_vm4, %v1252_v33 }
 0x385   : > { %v1559_v36 = vpop.f32.mrf.mxu1 }
 0x386   : > { %v1343_v37 = vadd.f32 %v1559_v36, %v1464_v35 }
 0x387   : > { %v1337_v38 = vpop.f32.mrf.mxu1 }
 0x388   : > { %1348 = vst.msk [vmem:[%s258_s24 + $0x8] sm:$0xff] %vm1346_vm5, %v1343_v37  ;;  %v1338_v39 = vadd.f32 %v1464_v35, %v1337_v38 }
 0x38a   : > { %1347 = vst.msk [vmem:[%s258_s24] sm:$0xff] %vm1346_vm5, %v1338_v39 }
 0x38b PF: > { %s23_s29 = sadd.s32 1, %s1697_s29  }
 0x38c   : > { %p20_p9 = scmp.ge.s32.totalorder %s23_s29, 4  }
 0x38e   :  { %22 = sbr.rel (!%p20_p9) target bundleno = 16 (0x10), region = 74 }

</bundles_post_ra>
